<compile_context>
chip_gen: v6e
topology: v6e:2x2x1
jax: 0.10.0
libtpu: 0.0.40
codegen_flags: <defaults>
</compile_context>

<pallas_src>
import jax
import jax.numpy as jnp
from jax.experimental import pallas as pl
from jax.experimental.pallas import tpu as pltpu


def _round_up(x, m):
    return (x + m - 1) // m * m


def _cdiv(a, b):
    return (a + b - 1) // b


def _vmem_budget_bytes():
    """Per-core VMEM budget (bytes): generation-aware with a conservative fallback."""
    cap = None
    try:
        info = pltpu.get_tpu_info()
        for name in ("vmem_capacity_bytes", "vmem_size_bytes", "vmem_bytes"):
            v = getattr(info, name, None)
            if v:
                cap = int(v)
                break
    except Exception:
        cap = None
    if cap is None:
        cap = 64 * 1024 * 1024           # v7x per-TensorCore physical (smallest generation)
    return int(cap * 3 // 4)             # headroom for compiler-internal scratch


def fused_gate_kernel(src_ref, dst_ref, img_ref, w_ref, b_ref, gate_ref,
                      out_src_ref, out_dst_ref):
    # src_ref / dst_ref : (tn, DP)  row tiles of the two node-feature inputs
    # img_ref           : (tn, IP)  row tile of image features
    # w_ref             : (IP, DP)  Wt zero-padded (resident, single-buffered)
    # b_ref             : (1, DP)   bt zero-padded (resident)
    # gate_ref          : (2, DP)   row 0 = f lanes, row 1 = g lanes (resident)
    # out_*_ref         : (tn, DP)  f*src+(1-f)*img_t  and  g*dst+(1-g)*img_t
    img_t = jnp.dot(img_ref[...], w_ref[...],
                    preferred_element_type=jnp.float32) + b_ref[...]
    f = gate_ref[0:1, :]
    g = gate_ref[1:2, :]
    # out = gate*x + (1-gate)*img_t, written as img_t + gate*(x - img_t).
    out_src_ref[...] = img_t + f * (src_ref[...] - img_t)
    out_dst_ref[...] = img_t + g * (dst_ref[...] - img_t)


def _pad2d(a, rows, cols):
    r, c = a.shape
    if r == rows and c == cols:
        return a                          # zero-copy path: already aligned, no extra HBM pass
    return jnp.pad(a, ((0, rows - r), (0, cols - c)))


def fusion_attention_forward(src, dst, img, params, *, tile_n=1024):
    """Returns (out_src, out_dst), each (N, Dnode) float32."""
    N, Dnode = src.shape
    Dimg = img.shape[1]

    DP = _round_up(Dnode, 128)            # lane-dense node-feature width
    IP = _round_up(Dimg, 128)             # lane-dense image-feature width

    # ---- VMEM-budgeted, adaptive row tiling ---------------------------------
    budget = _vmem_budget_bytes()
    w_bytes = 4 * IP * DP + 4 * 3 * DP                    # resident Wt + bt + gates
    per_row = 2 * 4 * (2 * DP + IP + 2 * DP)              # double-buffered activation tiles
    tn_cap = max(8, ((budget - w_bytes - (2 << 20)) // per_row) // 8 * 8)
    tn_target = max(8, min(tile_n, tn_cap))

    steps = max(1, _cdiv(N, tn_target))
    if steps > 1 and steps % 2 == 1:
        steps += 1                        # even grid: both v7x TensorCores get equal steps
    tn = _round_up(_cdiv(N, steps), 8)
    N_pad = steps * tn

    # Cover the actual footprint (plus headroom) without exceeding the device budget.
    est = tn * per_row + 2 * w_bytes + (4 << 20)
    vmem_limit = int(min(max(est, 32 << 20), max(budget, 32 << 20)))

    # ---- pad to lane/sublane-aligned shapes only when needed ----------------
    # Padded lanes of the outputs are exactly zero; padded *rows* carry (1-gate)*bt and are
    # sliced off below — they are never consumed.
    src_p = _pad2d(src, N_pad, DP)
    dst_p = _pad2d(dst, N_pad, DP)
    img_p = _pad2d(img, N_pad, IP)
    w_p = _pad2d(params["wt"], IP, DP)
    b_p = _pad2d(params["bt"], 1, DP)
    gate = jnp.concatenate(
        [jnp.full((1, DP), params["f"][0, 0], jnp.float32),
         jnp.full((1, DP), params["g"][0, 0], jnp.float32)], axis=0)

    cost = pl.CostEstimate(
        flops=2 * N_pad * IP * DP + 6 * N_pad * DP,
        transcendentals=0,
        bytes_accessed=4 * (N_pad * (2 * DP + IP) + 2 * N_pad * DP + IP * DP + 3 * DP),
    )

    def run(single_buffer_resident):
        def resident(shape):
            if single_buffer_resident:
                return pl.BlockSpec(shape, lambda i: (0, 0),
                                    pipeline_mode=pl.Buffered(1))
            return pl.BlockSpec(shape, lambda i: (0, 0))

        return pl.pallas_call(
            fused_gate_kernel,
            out_shape=(jax.ShapeDtypeStruct((N_pad, DP), jnp.float32),
                       jax.ShapeDtypeStruct((N_pad, DP), jnp.float32)),
            grid=(steps,),
            in_specs=[
                pl.BlockSpec((tn, DP), lambda i: (i, 0)),     # src rows
                pl.BlockSpec((tn, DP), lambda i: (i, 0)),     # dst rows
                pl.BlockSpec((tn, IP), lambda i: (i, 0)),     # img rows
                resident((IP, DP)),                           # Wt   (VMEM-resident)
                resident((1, DP)),                            # bt   (VMEM-resident)
                resident((2, DP)),                            # gates (VMEM-resident)
            ],
            out_specs=(pl.BlockSpec((tn, DP), lambda i: (i, 0)),
                       pl.BlockSpec((tn, DP), lambda i: (i, 0))),
            compiler_params=pltpu.CompilerParams(
                dimension_semantics=("parallel",),            # rows shard across TCs (v7x)
                vmem_limit_bytes=vmem_limit,
            ),
            cost_estimate=cost,
        )(src_p, dst_p, img_p, w_p, b_p, gate)

    try:
        out_src, out_dst = run(True)
    except Exception:
        # pipeline_mode=pl.Buffered(1) not supported on this jax/runtime version;
        # fall back to default (double-buffered) resident blocks.
        out_src, out_dst = run(False)

    if N_pad != N or DP != Dnode:
        out_src = out_src[:N, :Dnode]
        out_dst = out_dst[:N, :Dnode]
    return out_src, out_dst


def make_params(key, node_dim, image_dim, attn_dim):
    ks = jax.random.split(key, 6)
    # feature_transform: Linear(image_dim -> node_dim); stored as (in, out)
    wt = jax.random.normal(ks[0], (image_dim, node_dim), jnp.float32) * 0.1
    bt = jax.random.normal(ks[1], (1, node_dim), jnp.float32) * 0.1
    # attention Linear1: (2*node_dim -> attn_dim), stored split & transposed
    w1 = jax.random.normal(ks[2], (2 * node_dim, attn_dim), jnp.float32) * 0.1
    b1 = jax.random.normal(ks[3], (1, attn_dim), jnp.float32) * 0.1
    # attention Linear2: (attn_dim -> 1), stored as a (1, attn_dim) row
    w2 = jax.random.normal(ks[4], (1, attn_dim), jnp.float32) * 0.1
    b2 = jax.random.normal(ks[5], (1, 1), jnp.float32) * 0.1
    return {
        "wt": wt, "bt": bt,
        "w1s": w1[:node_dim, :], "w1i": w1[node_dim:, :], "b1": b1,
        "w2": w2, "b2": b2,
        "f": jnp.ones((1, 1), jnp.float32),   # nn.Parameter(torch.ones(1))
        "g": jnp.ones((1, 1), jnp.float32),   # nn.Parameter(torch.ones(1))
    }


def reference_forward(src, dst, img, p):
    """Pure-JAX reference keeping the FULL attention math (tanh / W2 / softmax)."""
    img_t = img @ p["wt"] + p["bt"]

    def attn(x):
        h = jnp.tanh(x @ p["w1s"] + img_t @ p["w1i"] + p["b1"])
        a = jnp.sum(h * p["w2"], axis=-1, keepdims=True) + p["b2"]
        return jax.nn.softmax(a, axis=-1)   # softmax over a length-1 axis == 1.0

    f = p["f"][0, 0]
    g = p["g"][0, 0]
    res_src = f * src + (1.0 - f) * (attn(src) * img_t)
    res_dst = g * dst + (1.0 - g) * (attn(dst) * img_t)
    return res_src, res_dst


if __name__ == "__main__":
    N, node_dim, image_dim, attn_dim = 24, 32, 48, 16

    key = jax.random.PRNGKey(0)
    k_src, k_dst, k_img, k_par = jax.random.split(key, 4)
    src = jax.random.normal(k_src, (N, node_dim), jnp.float32)
    dst = jax.random.normal(k_dst, (N, node_dim), jnp.float32)
    img = jax.random.normal(k_img, (N, image_dim), jnp.float32)
    params = make_params(k_par, node_dim, image_dim, attn_dim)
    # Non-trivial gates so both the residual and the transformed-image path are exercised
    # (init values of 1.0 would zero out the matmul path).
    params["f"] = jnp.full((1, 1), 0.3, jnp.float32)
    params["g"] = jnp.full((1, 1), 0.8, jnp.float32)

    # tile_n=16 gives a 2-step row grid at this toy size, exercising tiling + padding.
    out_src, out_dst = fusion_attention_forward(src, dst, img, params, tile_n=16)
    jax.block_until_ready((out_src, out_dst))

    ref_src, ref_dst = reference_forward(src, dst, img, params)
    assert jnp.allclose(out_src, ref_src, atol=1e-5, rtol=1e-5)
    assert jnp.allclose(out_dst, ref_dst, atol=1e-5, rtol=1e-5)

    print("KERNEL_OK")
</pallas_src>

<mosaic_0001>
module attributes {stable_mosaic.version = 11 : i64} {
  func.func @fused_gate_kernel(%arg0: i32, %arg1: memref<16x128xf32, #tpu.memory_space<vmem>>, %arg2: memref<16x128xf32, #tpu.memory_space<vmem>>, %arg3: memref<16x128xf32, #tpu.memory_space<vmem>>, %arg4: memref<128x128xf32, #tpu.memory_space<vmem>>, %arg5: memref<1x128xf32, #tpu.memory_space<vmem>>, %arg6: memref<2x128xf32, #tpu.memory_space<vmem>>, %arg7: memref<16x128xf32, #tpu.memory_space<vmem>>, %arg8: memref<16x128xf32, #tpu.memory_space<vmem>>) attributes {dimension_semantics = [#tpu.dimension_semantics<parallel>], iteration_bounds = array<i64: 2>, scalar_prefetch = 0 : i64, scratch_operands = 0 : i64, tpu.core_type = #tpu.core_type<tc>, window_params = [{transform_indices = @transform_0, window_bounds = array<i64: 16, 128>}, {transform_indices = @transform_1, window_bounds = array<i64: 16, 128>}, {transform_indices = @transform_2, window_bounds = array<i64: 16, 128>}, {pipeline_mode = #tpu.pipeline_mode<synchronous>, transform_indices = @transform_3, window_bounds = array<i64: 128, 128>}, {pipeline_mode = #tpu.pipeline_mode<synchronous>, transform_indices = @transform_4, window_bounds = array<i64: 1, 128>}, {pipeline_mode = #tpu.pipeline_mode<synchronous>, transform_indices = @transform_5, window_bounds = array<i64: 2, 128>}, {transform_indices = @transform_6, window_bounds = array<i64: 16, 128>}, {transform_indices = @transform_7, window_bounds = array<i64: 16, 128>}]} {
    %c0 = arith.constant 0 : index
    %c0_0 = arith.constant 0 : index
    %0 = vector.load %arg3[%c0, %c0_0] : memref<16x128xf32, #tpu.memory_space<vmem>>, vector<16x128xf32>
    %c0_1 = arith.constant 0 : index
    %c0_2 = arith.constant 0 : index
    %1 = vector.load %arg4[%c0_1, %c0_2] : memref<128x128xf32, #tpu.memory_space<vmem>>, vector<128x128xf32>
    %cst = arith.constant dense<0.000000e+00> : vector<16x128xf32>
    %2 = tpu.matmul %0, %1, %cst {dimension_numbers = #tpu.dot_dimension_numbers<[1], [0], [0], [1], [0, 0, 1, 1], [], []>} : vector<16x128xf32>, vector<128x128xf32>, vector<16x128xf32> -> vector<16x128xf32>
    %c0_3 = arith.constant 0 : index
    %c0_4 = arith.constant 0 : index
    %3 = vector.load %arg5[%c0_3, %c0_4] : memref<1x128xf32, #tpu.memory_space<vmem>>, vector<1x128xf32>
    %4 = vector.broadcast %3 : vector<1x128xf32> to vector<16x128xf32>
    %5 = arith.addf %2, %4 : vector<16x128xf32>
    %c0_5 = arith.constant 0 : index
    %c0_6 = arith.constant 0 : index
    %6 = vector.load %arg6[%c0_5, %c0_6] : memref<2x128xf32, #tpu.memory_space<vmem>>, vector<1x128xf32>
    %c1 = arith.constant 1 : index
    %c0_7 = arith.constant 0 : index
    %7 = vector.load %arg6[%c1, %c0_7] : memref<2x128xf32, #tpu.memory_space<vmem>>, vector<1x128xf32>
    %c0_8 = arith.constant 0 : index
    %c0_9 = arith.constant 0 : index
    %8 = vector.load %arg1[%c0_8, %c0_9] : memref<16x128xf32, #tpu.memory_space<vmem>>, vector<16x128xf32>
    %9 = arith.subf %8, %5 : vector<16x128xf32>
    %10 = vector.broadcast %6 : vector<1x128xf32> to vector<16x128xf32>
    %11 = arith.mulf %10, %9 : vector<16x128xf32>
    %12 = arith.addf %5, %11 : vector<16x128xf32>
    %c0_10 = arith.constant 0 : index
    %c0_11 = arith.constant 0 : index
    %13 = vector.load %arg7[%c0_10, %c0_11] : memref<16x128xf32, #tpu.memory_space<vmem>>, vector<16x128xf32>
    tpu.vector_store %arg7[%c0_10, %c0_11], %12 {strides = array<i32>} : memref<16x128xf32, #tpu.memory_space<vmem>>, vector<16x128xf32>,
    %c0_12 = arith.constant 0 : index
    %c0_13 = arith.constant 0 : index
    %14 = vector.load %arg2[%c0_12, %c0_13] : memref<16x128xf32, #tpu.memory_space<vmem>>, vector<16x128xf32>
    %15 = arith.subf %14, %5 : vector<16x128xf32>
    %16 = vector.broadcast %7 : vector<1x128xf32> to vector<16x128xf32>
    %17 = arith.mulf %16, %15 : vector<16x128xf32>
    %18 = arith.addf %5, %17 : vector<16x128xf32>
    %c0_14 = arith.constant 0 : index
    %c0_15 = arith.constant 0 : index
    %19 = vector.load %arg8[%c0_14, %c0_15] : memref<16x128xf32, #tpu.memory_space<vmem>>, vector<16x128xf32>
    tpu.vector_store %arg8[%c0_14, %c0_15], %18 {strides = array<i32>} : memref<16x128xf32, #tpu.memory_space<vmem>>, vector<16x128xf32>,
    return
  }
  func.func @transform_0(%arg0: i32) -> (i32, i32) {
    %c0_i32 = arith.constant 0 : i32
    %c0_i32_0 = arith.constant 0 : i32
    return %arg0, %c0_i32 : i32, i32
  }
  func.func @transform_1(%arg0: i32) -> (i32, i32) {
    %c0_i32 = arith.constant 0 : i32
    %c0_i32_0 = arith.constant 0 : i32
    return %arg0, %c0_i32 : i32, i32
  }
  func.func @transform_2(%arg0: i32) -> (i32, i32) {
    %c0_i32 = arith.constant 0 : i32
    %c0_i32_0 = arith.constant 0 : i32
    return %arg0, %c0_i32 : i32, i32
  }
  func.func @transform_3(%arg0: i32) -> (i32, i32) {
    %c0_i32 = arith.constant 0 : i32
    %c0_i32_0 = arith.constant 0 : i32
    %c0_i32_1 = arith.constant 0 : i32
    return %c0_i32, %c0_i32_0 : i32, i32
  }
  func.func @transform_4(%arg0: i32) -> (i32, i32) {
    %c0_i32 = arith.constant 0 : i32
    %c0_i32_0 = arith.constant 0 : i32
    %c0_i32_1 = arith.constant 0 : i32
    return %c0_i32, %c0_i32_0 : i32, i32
  }
  func.func @transform_5(%arg0: i32) -> (i32, i32) {
    %c0_i32 = arith.constant 0 : i32
    %c0_i32_0 = arith.constant 0 : i32
    %c0_i32_1 = arith.constant 0 : i32
    return %c0_i32, %c0_i32_0 : i32, i32
  }
  func.func @transform_6(%arg0: i32) -> (i32, i32) {
    %c0_i32 = arith.constant 0 : i32
    %c0_i32_0 = arith.constant 0 : i32
    return %arg0, %c0_i32 : i32, i32
  }
  func.func @transform_7(%arg0: i32) -> (i32, i32) {
    %c0_i32 = arith.constant 0 : i32
    %c0_i32_0 = arith.constant 0 : i32
    return %arg0, %c0_i32 : i32, i32
  }
}

module attributes {stable_mosaic.version = 11 : i64} {
  func.func @fused_gate_kernel(%arg0: i32, %arg1: memref<16x128xf32, #tpu.memory_space<vmem>>, %arg2: memref<16x128xf32, #tpu.memory_space<vmem>>, %arg3: memref<16x128xf32, #tpu.memory_space<vmem>>, %arg4: memref<128x128xf32, #tpu.memory_space<vmem>>, %arg5: memref<1x128xf32, #tpu.memory_space<vmem>>, %arg6: memref<2x128xf32, #tpu.memory_space<vmem>>, %arg7: memref<16x128xf32, #tpu.memory_space<vmem>>, %arg8: memref<16x128xf32, #tpu.memory_space<vmem>>) attributes {dimension_semantics = [#tpu.dimension_semantics<parallel>], iteration_bounds = array<i64: 2>, scalar_prefetch = 0 : i64, scratch_operands = 0 : i64, tpu.core_type = #tpu.core_type<tc>, window_params = [{transform_indices = @transform_0, window_bounds = array<i64: 16, 128>}, {transform_indices = @transform_1, window_bounds = array<i64: 16, 128>}, {transform_indices = @transform_2, window_bounds = array<i64: 16, 128>}, {pipeline_mode = #tpu.pipeline_mode<synchronous>, transform_indices = @transform_3, window_bounds = array<i64: 128, 128>}, {pipeline_mode = #tpu.pipeline_mode<synchronous>, transform_indices = @transform_4, window_bounds = array<i64: 1, 128>}, {pipeline_mode = #tpu.pipeline_mode<synchronous>, transform_indices = @transform_5, window_bounds = array<i64: 2, 128>}, {transform_indices = @transform_6, window_bounds = array<i64: 16, 128>}, {transform_indices = @transform_7, window_bounds = array<i64: 16, 128>}]} {
    %c0 = arith.constant 0 : index
    %c0_0 = arith.constant 0 : index
    %0 = vector.load %arg3[%c0, %c0_0] : memref<16x128xf32, #tpu.memory_space<vmem>>, vector<16x128xf32>
    %c0_1 = arith.constant 0 : index
    %c0_2 = arith.constant 0 : index
    %1 = vector.load %arg4[%c0_1, %c0_2] : memref<128x128xf32, #tpu.memory_space<vmem>>, vector<128x128xf32>
    %cst = arith.constant dense<0.000000e+00> : vector<16x128xf32>
    %2 = tpu.matmul %0, %1, %cst {dimension_numbers = #tpu.dot_dimension_numbers<[1], [0], [0], [1], [0, 0, 1, 1], [], []>} : vector<16x128xf32>, vector<128x128xf32>, vector<16x128xf32> -> vector<16x128xf32>
    %c0_3 = arith.constant 0 : index
    %c0_4 = arith.constant 0 : index
    %3 = vector.load %arg5[%c0_3, %c0_4] : memref<1x128xf32, #tpu.memory_space<vmem>>, vector<1x128xf32>
    %4 = vector.broadcast %3 : vector<1x128xf32> to vector<16x128xf32>
    %5 = arith.addf %2, %4 : vector<16x128xf32>
    %c0_5 = arith.constant 0 : index
    %c0_6 = arith.constant 0 : index
    %6 = vector.load %arg6[%c0_5, %c0_6] : memref<2x128xf32, #tpu.memory_space<vmem>>, vector<1x128xf32>
    %c1 = arith.constant 1 : index
    %c0_7 = arith.constant 0 : index
    %7 = vector.load %arg6[%c1, %c0_7] : memref<2x128xf32, #tpu.memory_space<vmem>>, vector<1x128xf32>
    %c0_8 = arith.constant 0 : index
    %c0_9 = arith.constant 0 : index
    %8 = vector.load %arg1[%c0_8, %c0_9] : memref<16x128xf32, #tpu.memory_space<vmem>>, vector<16x128xf32>
    %9 = arith.subf %8, %5 : vector<16x128xf32>
    %10 = vector.broadcast %6 : vector<1x128xf32> to vector<16x128xf32>
    %11 = arith.mulf %10, %9 : vector<16x128xf32>
    %12 = arith.addf %5, %11 : vector<16x128xf32>
    %c0_10 = arith.constant 0 : index
    %c0_11 = arith.constant 0 : index
    %13 = vector.load %arg7[%c0_10, %c0_11] : memref<16x128xf32, #tpu.memory_space<vmem>>, vector<16x128xf32>
    tpu.vector_store %arg7[%c0_10, %c0_11], %12 {strides = array<i32>} : memref<16x128xf32, #tpu.memory_space<vmem>>, vector<16x128xf32>,
    %c0_12 = arith.constant 0 : index
    %c0_13 = arith.constant 0 : index
    %14 = vector.load %arg2[%c0_12, %c0_13] : memref<16x128xf32, #tpu.memory_space<vmem>>, vector<16x128xf32>
    %15 = arith.subf %14, %5 : vector<16x128xf32>
    %16 = vector.broadcast %7 : vector<1x128xf32> to vector<16x128xf32>
    %17 = arith.mulf %16, %15 : vector<16x128xf32>
    %18 = arith.addf %5, %17 : vector<16x128xf32>
    %c0_14 = arith.constant 0 : index
    %c0_15 = arith.constant 0 : index
    %19 = vector.load %arg8[%c0_14, %c0_15] : memref<16x128xf32, #tpu.memory_space<vmem>>, vector<16x128xf32>
    tpu.vector_store %arg8[%c0_14, %c0_15], %18 {strides = array<i32>} : memref<16x128xf32, #tpu.memory_space<vmem>>, vector<16x128xf32>,
    return
  }
  func.func @transform_0(%arg0: i32) -> (i32, i32) {
    %c0_i32 = arith.constant 0 : i32
    %c0_i32_0 = arith.constant 0 : i32
    return %arg0, %c0_i32 : i32, i32
  }
  func.func @transform_1(%arg0: i32) -> (i32, i32) {
    %c0_i32 = arith.constant 0 : i32
    %c0_i32_0 = arith.constant 0 : i32
    return %arg0, %c0_i32 : i32, i32
  }
  func.func @transform_2(%arg0: i32) -> (i32, i32) {
    %c0_i32 = arith.constant 0 : i32
    %c0_i32_0 = arith.constant 0 : i32
    return %arg0, %c0_i32 : i32, i32
  }
  func.func @transform_3(%arg0: i32) -> (i32, i32) {
    %c0_i32 = arith.constant 0 : i32
    %c0_i32_0 = arith.constant 0 : i32
    %c0_i32_1 = arith.constant 0 : i32
    return %c0_i32, %c0_i32_0 : i32, i32
  }
  func.func @transform_4(%arg0: i32) -> (i32, i32) {
    %c0_i32 = arith.constant 0 : i32
    %c0_i32_0 = arith.constant 0 : i32
    %c0_i32_1 = arith.constant 0 : i32
    return %c0_i32, %c0_i32_0 : i32, i32
  }
  func.func @transform_5(%arg0: i32) -> (i32, i32) {
    %c0_i32 = arith.constant 0 : i32
    %c0_i32_0 = arith.constant 0 : i32
    %c0_i32_1 = arith.constant 0 : i32
    return %c0_i32, %c0_i32_0 : i32, i32
  }
  func.func @transform_6(%arg0: i32) -> (i32, i32) {
    %c0_i32 = arith.constant 0 : i32
    %c0_i32_0 = arith.constant 0 : i32
    return %arg0, %c0_i32 : i32, i32
  }
  func.func @transform_7(%arg0: i32) -> (i32, i32) {
    %c0_i32 = arith.constant 0 : i32
    %c0_i32_0 = arith.constant 0 : i32
    return %arg0, %c0_i32 : i32, i32
  }
}

</mosaic_0001>

<bundles_post_ra>
// kernel: tpu_custom_call.1
= control target key start
LH: loop header
LB: loop body
LE: loop exit
PB: predicated region body
PF: predicated region fallthrough
CT: control target
= control target key end

     0   :  { %s1496_s0 = inlined_call_operand.hbm [shape: f32[32,128], index: 0, kind: input, shape index: {}]   ;;  %s1497_s1 = inlined_call_operand.hbm [shape: f32[32,128], index: 1, kind: input, shape index: {}]   ;;  %s1498_s2 = inlined_call_operand.hbm [shape: f32[32,128], index: 2, kind: input, shape index: {}]   ;;  %s1499_s3 = inlined_call_operand.hbm [shape: f32[128,128], index: 3, kind: input, shape index: {}]   ;;  %s1500_s4 = inlined_call_operand.vmem [shape: f32[1,128], index: 4, kind: input, shape index: {}]   ;;  %s1501_s5 = inlined_call_operand.vmem [shape: f32[2,128], index: 5, kind: input, shape index: {}]   ;;  %s1502_s6 = inlined_call_operand.hbm [shape: f32[32,128], index: 6, kind: output, shape index: {0}]   ;;  %s1503_s7 = inlined_call_operand.hbm [shape: f32[32,128], index: 7, kind: output, shape index: {1}]  }
   0x1   :  { %1520 = sst [smem:[#allocation23_spill]] %s1497_s1 }
   0x2   :  { %13 = vsyncpa [#allocation3], 0 }
   0x3   :  { %15 = vsyncpa [#allocation3 + $0x1], 0 }
   0x4   :  { %16 = vsyncpa [#allocation6], 0 }
   0x5   :  { %18 = vsyncpa [#allocation6 + $0x1], 0 }
   0x6   :  { %19 = vsyncpa [#allocation9], 0 }
   0x7   :  { %20 = vsyncpa [#allocation4], 0 }
   0x8   :  { %22 = vsyncpa [#allocation4 + $0x1], 0 }
   0x9   :  { %23 = vsyncpa [#allocation12], 0 }
   0xa   :  { %25 = vsyncpa [#allocation12 + $0x1], 0  ;;  %s1157_s24 = smov 0   ;;  %s1159_s25 = smov 0  }
   0xb   :  { %s1161_s26 = smov 0   ;;  %s1163_s27 = smov 0  }
   0xc LB: > { %1521 = sst [smem:[#allocation18_spill]] %s1101_s26  ;;  %s1178_s28 = sadd.s32 1, %s1105_s27   ;;  %s1105_s27 = sphi %s1163_s27, %s1548_s27   ;;  %s1101_s26 = sphi %s1161_s26, %s1550_s26   ;;  %s1097_s25 = sphi %s1159_s25, %s1552_s25   ;;  %s1093_s24 = sphi %s1157_s24, %s1551_s24  }
   0xd   : > { %1522 = sst [smem:[#allocation19_spill]] %s1105_s27  ;;  %s38_s29 = sadd.s32 1, %s1101_s26 }
   0xe   : > { %1523 = sst [smem:[#allocation20_spill]] %s1178_s28  ;;  %s35_s30 = ssub.s32 %s1105_s27, %s1178_s28 }
   0xf   : > { %p1504_p0 = scmp.ne.s32.totalorder %s1101_s26, %s1097_s25  ;;  %p36_p1 = scmp.eq.s32.totalorder %s35_s30, 0 }
  0x10   : > { %p46_p2 = scmp.eq.s32.totalorder %s1105_s27, 0  ;;  %p853_p5 = scmp.lt.s32.totalorder %s1105_s27, 2 }
  0x11   : > { %s1187_s8 = scalar_select %p36_p1, %s1101_s26, %s38_s29  }
  0x12   : > { %p47_p3 = por %p46_p2, %p1504_p0  ;;  %s1509_s9 = sand.u32 1, %s1101_s26  }
  0x13   : > { %1524 = sst [smem:[#allocation21_spill]] %s1187_s8  ;;  %s1197_s10 = sshll.u32 %s1509_s9, 4 }
  0x14   : > { %s1200_s11 = sshll.u32 %s1105_s27, 8  ;;  %p1202_p6 = pnand %p853_p5, %p47_p3 }
  0x15   : > { %s282_s13 = sand.u32 1, %s1105_s27   ;;  %s1526_s1 = sld [smem:[#allocation23_spill]] }
  0x16   : > { %s286_s17 = scalar_lea.vmem [#allocation5], %s1197_s10  ;;  %s1216_s19 = scalar_lea.sflag [#allocation6], %s282_s13 }
  0x17   : > { %s293_s18 = sshll.u32 %s286_s17, 4  ;;  %p1222_p8 = pneg %p1202_p6  ;;  %s1214_s18 = int_to_ptr.vmem [resolvable:$true] %s293_s18 }
  0x1b   : > { %s1211_s16 = scalar_lea.hbm %s1526_s1, %s1200_s11  ;;  %s898_s29 = scalar_lea.hbm %s1526_s1, 512 }
  0x1c   : > { %s893_s20 = scalar_lea.hbm %s1211_s16, 256  ;;  %p899_p11 = scmp.lt.s32.totalorder %s1211_s16, %s1526_s1 }
  0x1d   : > { %p894_p7 = scmp.ne.s32.totalorder %s1211_s16, %s893_s20  ;;  %p900_p12 = scmp.lt.s32.totalorder %s898_s29, %s893_s20 }
  0x1f   : > { %p896_p9 = pnand %p1222_p8, %p894_p7  ;;  %p901_p13 = por %p900_p12, %p899_p11 }
  0x21   : > { %p897_p10 = pneg %p896_p9 }
  0x23   : > { %p902_p1 = pnand %p901_p13, %p897_p10 }
  0x25   : > { %905 = shalt.err (!%p902_p1)
}
  0x26   : > { %s906_s13 = scalar_lea.vmem %s1214_s18, 256  ;;  %s1107_s15 = smov [#allocation5]  }
  0x27   : > { %p907_p2 = scmp.ne.s32.totalorder %s1214_s18, %s906_s13  ;;  %s911_s17 = sshll.u32 %s1107_s15, 4  ;;  %s912_s17 = int_to_ptr.vmem [resolvable:$false] %s911_s17 }
  0x28   : > { %s913_s22 = scalar_lea.vmem %s912_s17, 512  ;;  %p914_p7 = scmp.lt.s32.totalorder %s1214_s18, %s912_s17 }
  0x29   : > { %p909_p3 = pnand %p907_p2, %p1222_p8  ;;  %p915_p9 = scmp.lt.s32.totalorder %s913_s22, %s906_s13 }
  0x2b   : > { %p910_p5 = pneg %p909_p3  ;;  %p916_p4 = por %p915_p9, %p914_p7 }
  0x2d   : > { %p917_p0 = pnand %p916_p4, %p910_p5 }
  0x2f   : > { %920 = shalt.err (!%p917_p0)
}
  0x30   : > { %s1505_s20 = smov 128   ;;  %s1507_s23 = smov 8  }
  0x31   : > { %841 = dma.hbm_to_vmem [thread:$0]  (!%p1202_p6), %s1211_s16, 256, %s1214_s18, %s1216_s19, %s1505_s20, %s1505_s20, %s1507_s23  }
  0x32   : > { %s1249_s29 = sadd.s32 4294967295, %s1105_s27   ;;  %s728_s30 = sadd.s32 4294967294, %s1105_s27  }
  0x33   : > { %p51_p0 = scmp.ne.s32.totalorder %s1097_s25, %s1093_s24  ;;  %p1514_p4 = scmp.eq.s32.totalorder %s1249_s29, 0 }
  0x34   : > { %p190_p10 = scmp.eq.s32.totalorder %s1249_s29, 1  ;;  %p196_p11 = scmp.eq.s32.totalorder %s728_s30, 1 }
  0x35   : > { %p1258_p12 = por %p1514_p4, %p51_p0  ;;  %p729_p13 = scmp.ge.s32.totalorder %s1105_s27, 1 }
  0x36   : > { %p1529_p1 = scmp.ne.s32.totalorder %s1101_s26, %s1097_s25  ;;  %p1270_p3 = por %p196_p11, %p51_p0 }
  0x37   : > { %s1528_s14 = scalar_select %p1258_p12, 1, 0 }
  0x38   : > { %p1266_p2 = por %p190_p10, %p1529_p1  ;;  %p229_p5 = scmp.lt.s32.totalorder %s1105_s27, 3 }
  0x39   : > { %s1531_s18 = scalar_select %p1270_p3, 1, 0 }
  0x3a   : > { %s1530_s16 = scalar_select %p1266_p2, 1, 0 }
  0x3b   : > { %1532 = sst [smem:[#allocation22_spill]] %s1531_s18  ;;  %p1275_p7 = pnand %p729_p13, %p229_p5 }
  0x3c   : > { %s1110_s15 = smov [#allocation8]   ;;  %s1287_s20 = scalar_lea.hbm %s1496_s0, %s1200_s11 }
  0x3d   : > { %s1533_s13 = scalar_select %p1275_p7, 1, 0 }
  0x3e   : > { %s241_s17 = sshll.u32 %s1110_s15, 4  ;;  %p831_p9 = pneg %p1275_p7  ;;  %s1279_s17 = int_to_ptr.vmem [resolvable:$true] %s241_s17 }
  0x3f   : > { %s265_s23 = scalar_lea.vmem [#allocation2], %s1197_s10  ;;  %s1535_s15 = sand.u32 1, %s1101_s26  }
  0x40   : > { %s272_s9 = sshll.u32 %s265_s23, 4  ;;  %p1292_p0 = pnand %p831_p9, %p1514_p4  ;;  %s1296_s9 = int_to_ptr.vmem [resolvable:$true] %s272_s9 }
  0x41   : > { %s262_s8 = scalar_lea.sflag [#allocation3], %s1535_s15  ;;  %s921_s28 = scalar_lea.hbm %s1287_s20, 256 }
  0x42   : > { %s1534_s1 = scalar_select %p1292_p0, 1, 0 }
  0x43   : > { %p922_p10 = scmp.ne.s32.totalorder %s1287_s20, %s921_s28  ;;  %s926_s27 = scalar_lea.hbm %s1496_s0, 512 }
  0x44   : > { %p927_p1 = scmp.lt.s32.totalorder %s1287_s20, %s1496_s0  ;;  %p928_p5 = scmp.lt.s32.totalorder %s926_s27, %s921_s28 }
  0x45   : > { %p924_p11 = pnand %p922_p10, %p1222_p8 }
  0x46   : > { %p929_p9 = por %p928_p5, %p927_p1 }
  0x47   : > { %p925_p13 = pneg %p924_p11 }
  0x49   : > { %p930_p4 = pnand %p929_p9, %p925_p13 }
  0x4b   : > { %933 = shalt.err (!%p930_p4)
}
  0x4c   : > { %s934_s15 = scalar_lea.vmem %s1296_s9, 256  ;;  %s1111_s26 = smov [#allocation2]  }
  0x4d   : > { %p935_p3 = scmp.ne.s32.totalorder %s1296_s9, %s934_s15  ;;  %s939_s22 = sshll.u32 %s1111_s26, 4  ;;  %s940_s22 = int_to_ptr.vmem [resolvable:$false] %s939_s22 }
  0x4e   : > { %s941_s30 = scalar_lea.vmem %s940_s22, 512  ;;  %p942_p2 = scmp.lt.s32.totalorder %s1296_s9, %s940_s22 }
  0x4f   : > { %p937_p10 = pnand %p935_p3, %p1222_p8  ;;  %p943_p12 = scmp.lt.s32.totalorder %s941_s30, %s934_s15 }
  0x51   : > { %p938_p11 = pneg %p937_p10  ;;  %p944_p7 = por %p943_p12, %p942_p2 }
  0x53   : > { %p945_p0 = pnand %p944_p7, %p938_p11 }
  0x55   : > { %948 = shalt.err (!%p945_p0)
}
  0x56   : > { %s1536_s27 = smov 8   ;;  %s1537_s28 = smov 128  }
  0x57   : > { %838 = dma.hbm_to_vmem [thread:$0]  (!%p1202_p6), %s1287_s20, 256, %s1296_s9, %s262_s8, %s1537_s28, %s1537_s28, %s1536_s27  }
  0x58   : > { %s1327_s23 = scalar_lea.hbm %s1498_s2, %s1200_s11  ;;  %p1538_p4 = scmp.ne.s32.totalorder %s1534_s1, 0 }
  0x59   : > { %s960_s15 = scalar_lea.vmem %s1279_s17, 2048  ;;  %p968_p0 = scmp.lt.s32.totalorder %s1279_s17, %s1279_s17 }
  0x5a   : > { %p951_p12 = pneg %p1538_p4  ;;  %p961_p2 = scmp.ne.s32.totalorder %s1279_s17, %s960_s15 }
  0x5b   : > { %p969_p13 = scmp.lt.s32.totalorder %s960_s15, %s960_s15 }
  0x5c   : > { %p963_p3 = pnand %p961_p2, %p951_p12 }
  0x5d   : > { %p970_p1 = por %p969_p13, %p968_p0 }
  0x5e   : > { %p964_p7 = pneg %p963_p3 }
  0x60   : > { %p971_p5 = pnand %p970_p1, %p964_p7 }
  0x62   : > { %974 = shalt.err (!%p971_p5)
}
  0x63   : > { %834 = dma.hbm_to_vmem [thread:$0]  (!%p1538_p4), %s1499_s3, 2048, %s1279_s17, [#allocation9], %s1537_s28, %s1537_s28, %s1536_s27  }
  0x64   : > { %s307_s11 = scalar_lea.vmem [#allocation7], %s1197_s10  ;;  %s975_s22 = scalar_lea.hbm %s1327_s23, 256 }
  0x65   : > { %s314_s20 = sshll.u32 %s307_s11, 4  ;;  %p976_p9 = scmp.ne.s32.totalorder %s1327_s23, %s975_s22  ;;  %s315_s20 = int_to_ptr.vmem [resolvable:$true] %s314_s20 }
  0x66   : > { %s980_s26 = scalar_lea.hbm %s1498_s2, 512  ;;  %p981_p12 = scmp.lt.s32.totalorder %s1327_s23, %s1498_s2 }
  0x67   : > { %p978_p10 = pnand %p976_p9, %p1222_p8  ;;  %p982_p2 = scmp.lt.s32.totalorder %s980_s26, %s975_s22 }
  0x69   : > { %p979_p11 = pneg %p978_p10  ;;  %p983_p3 = por %p982_p2, %p981_p12 }
  0x6b   : > { %p984_p7 = pnand %p983_p3, %p979_p11 }
  0x6d   : > { %987 = shalt.err (!%p984_p7)
}
  0x6e   : > { %s988_s10 = scalar_lea.vmem %s315_s20, 256  ;;  %s1112_s17 = smov [#allocation7]  }
  0x6f   : > { %p989_p4 = scmp.ne.s32.totalorder %s315_s20, %s988_s10  ;;  %s993_s8 = sshll.u32 %s1112_s17, 4  ;;  %s994_s8 = int_to_ptr.vmem [resolvable:$false] %s993_s8 }
  0x70   : > { %s995_s9 = scalar_lea.vmem %s994_s8, 512  ;;  %p996_p1 = scmp.lt.s32.totalorder %s315_s20, %s994_s8 }
  0x71   : > { %p991_p0 = pnand %p989_p4, %p1222_p8  ;;  %p997_p5 = scmp.lt.s32.totalorder %s995_s9, %s988_s10 }
  0x73   : > { %p992_p13 = pneg %p991_p0  ;;  %p998_p9 = por %p997_p5, %p996_p1 }
  0x75   : > { %p999_p10 = pnand %p998_p9, %p992_p13 }
  0x77   : > { %1002 = shalt.err (!%p999_p10)
}
  0x78   : > { %844 = dma.hbm_to_vmem [thread:$0]  (!%p1202_p6), %s1327_s23, 256, %s315_s20, %s1216_s19, %s1537_s28, %s1537_s28, %s1536_s27  }
  0x79   : > { %p1539_p8 = scmp.ne.s32.totalorder %s1533_s13, 0 }
  0x7a   : > { %s1368_s21 = sand.u32 (!%p1539_p8), 1, %s1097_s25   ;;  %p1540_p11 = scmp.ne.s32.totalorder (!%p1539_p8), %s1528_s14, 0 }
  0x7b   : > { %326 = sbr.rel (%p1539_p8) target bundleno = 407 (0x197), region = 44  ;;  %s1371_s11 = sshll.u32 (!%p1539_p8), %s1368_s21, 4 }
  0x7c   : > { %s329_s22 = scalar_lea.sflag (!%p1539_p8), [#allocation3], %s1368_s21  ;;  %s332_s12 = scalar_lea.vmem (!%p1539_p8), [#allocation2], %s1371_s11 }
  0x80   : > { %1072 = dma.done.wait (%p1540_p11), %s329_s22, 256  }
  0x81   : > { %1074 = vsyncadd (%p1540_p11), %s329_s22, 4294967040  ;;  %s337_s19 = sand.u32 1, %s1249_s29   ;;  %s341_s27 = scalar_lea.vmem [#allocation5], %s1371_s11 }
  0x82   : > { %s338_s13 = scalar_lea.sflag [#allocation6], %s337_s19 }
  0x83   : > { %1076 = dma.done.wait (%p1540_p11), %s338_s13, 512  }
  0x84   : > { %1078 = vsyncadd (%p1540_p11), %s338_s13, 4294966784  ;;  %s350_s28 = scalar_lea.vmem [#allocation7], %s1371_s11  ;;  %p1541_p6 = scmp.eq.s32.totalorder %s1249_s29, 0 }
  0x86   : > { %1080 = dma.done.wait (%p1541_p6), [#allocation9], 2048   ;;  %p1542_p12 = pmov %p1541_p6 }
  0x87   : > { %v422_v0 = vld [vmem:[#allocation8 + $0x78] sm:$0xff]  ;;  %v421_v1 = vld [vmem:[#allocation8 + $0x70] sm:$0xff]  ;;  %v420_v2 = vld [vmem:[#allocation8 + $0x68] sm:$0xff]  ;;  %s762_s18 = sshll.u32 %s1249_s29, 8  ;;  %s392_s15 = scalar_lea.vmem [#allocation10], %s1371_s11 }
  0x88   : > { %1082 = vsyncadd (%p1542_p12), [#allocation9], 4294965248  ;;  %782 = vmatprep.subr.mxu0 %v422_v0  ;;  %v419_v3 = vld [vmem:[#allocation8 + $0x60] sm:$0xff]  ;;  %v418_v5 = vld [vmem:[#allocation8 + $0x58] sm:$0xff]  ;;  %s554_s10 = sshll.u32 %s392_s15, 4  ;;  %s1416_s9 = scalar_lea.hbm %s1502_s6, %s762_s18  ;;  %s1419_s10 = int_to_ptr.vmem [resolvable:$true] %s554_s10 }
  0x89   : > { %783 = vmatpush3.msra.mxu0 %v422_v0  ;;  %v405_v4 = vld [vmem:[%s350_s28] sm:$0xff]  ;;  %v416_v7 = vld [vmem:[#allocation8 + $0x48] sm:$0xff]  ;;  %v414_v9 = vld [vmem:[#allocation8 + $0x38] sm:$0xff]  ;;  %s399_s22 = scalar_lea.vmem [#allocation11], %s1371_s11  ;;  %s1424_s13 = scalar_lea.hbm %s1503_s7, %s762_s18 }
  0x8a   : > { %784 = vmatprep.subr.mxu0 %v421_v1  ;;  %814 = vmatprep.mubr.f32.mxu0 %v405_v4  ;;  %v417_v6 = vld [vmem:[#allocation8 + $0x50] sm:$0xff]  ;;  %v415_v8 = vld [vmem:[#allocation8 + $0x40] sm:$0xff]  ;;  %v412_v11 = vld [vmem:[#allocation8 + $0x28] sm:$0xff]  ;;  %s536_s11 = scalar_lea.sflag [#allocation4], %s1368_s21  ;;  %p1543_p3 = scmp.ne.s32.totalorder %s1530_s16, 0 }
  0x8b   : > { %785 = vmatpush3.msra.mxu0 %v421_v1  ;;  %v413_v10 = vld [vmem:[#allocation8 + $0x30] sm:$0xff]  ;;  %v411_v12 = vld [vmem:[#allocation8 + $0x20] sm:$0xff]  ;;  %v410_v13 = vld [vmem:[#allocation8 + $0x18] sm:$0xff] }
  0x8c   : > { %786 = vmatprep.subr.mxu0 %v420_v2  ;;  %v409_v14 = vld [vmem:[#allocation8 + $0x10] sm:$0xff]  ;;  %v408_v15 = vld [vmem:[#allocation8 + $0x8] sm:$0xff]  ;;  %v407_v16 = vld [vmem:[#allocation8] sm:$0xff] }
  0x8d   : > { %787 = vmatpush3.msra.mxu0 %v420_v2  ;;  %v406_v17 = vld [vmem:[%s350_s28 + $0x8] sm:$0xff]  ;;  %v748_v18 = vld [vmem:[%s1500_s4] ss:$0 sm:$0xff]  ;;  %v750_v24 = vld [vmem:[%s1501_s5 + $0x1] ss:$0 sm:$0xff]  ;;  %s1113_s28 = smov [#allocation10]  }
  0x8e   : > { %788 = vmatprep.subr.mxu0 %v419_v3  ;;  %v508_v20 = vld [vmem:[%s332_s12 + $0x8] sm:$0xff]  ;;  %v749_v23 = vld [vmem:[%s1501_s5] ss:$0 sm:$0xff]  ;;  %s1007_s14 = sshll.u32 %s1113_s28, 4  ;;  %s1008_s14 = int_to_ptr.vmem [resolvable:$false] %s1007_s14 }
  0x8f   : > { %789 = vmatpush3.msra.mxu0 %v419_v3  ;;  %v522_v21 = vld [vmem:[%s341_s27 + $0x8] sm:$0xff]  ;;  %v507_v26 = vld [vmem:[%s332_s12] sm:$0xff]  ;;  %s570_s12 = sshll.u32 %s399_s22, 4  ;;  %s1009_s23 = scalar_lea.vmem %s1008_s14, 512  ;;  %s1426_s12 = int_to_ptr.vmem [resolvable:$true] %s570_s12 }
  0x90   : > { %790 = vmatprep.subr.mxu0 %v418_v5  ;;  %v521_v27 = vld [vmem:[%s341_s27] sm:$0xff]  ;;  %s1003_s27 = scalar_lea.vmem %s1419_s10, 256  ;;  %p1010_p0 = scmp.lt.s32.totalorder %s1419_s10, %s1008_s14 }
  0x91   : > { %791 = vmatpush3.msra.mxu0 %v418_v5  ;;  %p1004_p2 = scmp.ne.s32.totalorder %s1419_s10, %s1003_s27  ;;  %p1011_p13 = scmp.lt.s32.totalorder %s1009_s23, %s1003_s27 }
  0x92   : > { %792 = vmatprep.subr.mxu0 %v417_v6 }
  0x93   : > { %793 = vmatpush3.msra.mxu0 %v417_v6  ;;  %p1005_p7 = pnand %p1004_p2, %p1543_p3  ;;  %p1012_p1 = por %p1011_p13, %p1010_p0 }
  0x94   : > { %794 = vmatprep.subr.mxu0 %v416_v7 }
  0x95   : > { %795 = vmatpush3.msra.mxu0 %v416_v7  ;;  %p1006_p4 = pneg %p1005_p7 }
  0x96   : > { %796 = vmatprep.subr.mxu0 %v415_v8 }
  0x97   : > { %797 = vmatpush3.msra.mxu0 %v415_v8  ;;  %p1013_p5 = pnand %p1012_p1, %p1006_p4 }
  0x98   : > { %798 = vmatprep.subr.mxu0 %v414_v9 }
  0x99   : > { %799 = vmatpush3.msra.mxu0 %v414_v9 }
  0x9a   : > { %800 = vmatprep.subr.mxu0 %v413_v10 }
  0x9b   : > { %801 = vmatpush3.msra.mxu0 %v413_v10 }
  0x9c   : > { %802 = vmatprep.subr.mxu0 %v412_v11 }
  0x9d   : > { %803 = vmatpush3.msra.mxu0 %v412_v11 }
  0x9e   : > { %804 = vmatprep.subr.mxu0 %v411_v12 }
  0x9f   : > { %805 = vmatpush3.msra.mxu0 %v411_v12 }
  0xa0   : > { %806 = vmatprep.subr.mxu0 %v410_v13 }
  0xa1   : > { %807 = vmatpush3.msra.mxu0 %v410_v13 }
  0xa2   : > { %808 = vmatprep.subr.mxu0 %v409_v14 }
  0xa3   : > { %809 = vmatpush3.msra.mxu0 %v409_v14 }
  0xa4   : > { %810 = vmatprep.subr.mxu0 %v408_v15 }
  0xa5   : > { %811 = vmatpush3.msra.mxu0 %v408_v15 }
  0xa6   : > { %812 = vmatprep.subr.mxu0 %v407_v16 }
  0xa7   : > { %813 = vmatpush3.msra.mxu0 %v407_v16 }
  0xa8   : > { %815 = vmatmul.mubr.f32.vlgmr.msra.gmra.mxu0 %v406_v17 }
 0x168   : > { %v816_v19 = vpop.f32.mrf.mxu0 }
 0x169   : > { %v502_v22 = vadd.f32 %v816_v19, %v748_v18 }
 0x16a   : > { %v496_v25 = vpop.f32.mrf.mxu0 }
 0x16b   : > { %v510_v28 = vsub.f32 %v508_v20, %v502_v22  ;;  %v524_v29 = vsub.f32 %v522_v21, %v502_v22  ;;  %v497_v30 = vadd.f32 %v748_v18, %v496_v25 }
 0x16d   : > { %v516_v31 = vmul.f32 %v749_v23, %v510_v28  ;;  %v530_v32 = vmul.f32 %v750_v24, %v524_v29  ;;  %v509_v33 = vsub.f32 %v507_v26, %v497_v30  ;;  %v523_v34 = vsub.f32 %v521_v27, %v497_v30 }
 0x16f   : > { %v518_v35 = vadd.f32 %v516_v31, %v502_v22  ;;  %v532_v36 = vadd.f32 %v530_v32, %v502_v22  ;;  %v515_v37 = vmul.f32 %v749_v23, %v509_v33  ;;  %v529_v38 = vmul.f32 %v750_v24, %v523_v34 }
 0x171   : > { %520 = vst [vmem:[%s392_s15 + $0x8] sm:$0xff] %v518_v35  ;;  %534 = vst [vmem:[%s399_s22 + $0x8] sm:$0xff] %v532_v36  ;;  %v517_v39 = vadd.f32 %v515_v37, %v497_v30  ;;  %v531_v40 = vadd.f32 %v529_v38, %v497_v30 }
 0x173   : > { %519 = vst [vmem:[%s392_s15] sm:$0xff] %v517_v39  ;;  %533 = vst [vmem:[%s399_s22] sm:$0xff] %v531_v40 }
 0x174   : > { %1016 = shalt.err (!%p1013_p5)
}
 0x175   : > { %s1017_s20 = scalar_lea.hbm %s1416_s9, 256  ;;  %s1021_s26 = scalar_lea.hbm %s1502_s6, 512 }
 0x176   : > { %p1018_p9 = scmp.ne.s32.totalorder %s1416_s9, %s1017_s20  ;;  %p1022_p11 = scmp.lt.s32.totalorder %s1416_s9, %s1502_s6 }
 0x177   : > { %p1023_p6 = scmp.lt.s32.totalorder %s1021_s26, %s1017_s20 }
 0x178   : > { %p1019_p10 = pnand %p1018_p9, %p1543_p3 }
 0x179   : > { %p1024_p12 = por %p1023_p6, %p1022_p11 }
 0x17a   : > { %p1020_p8 = pneg %p1019_p10 }
 0x17c   : > { %p1025_p2 = pnand %p1024_p12, %p1020_p8 }
 0x17e   : > { %1028 = shalt.err (!%p1025_p2)
}
 0x17f   : > { %s1114_s17 = smov 128   ;;  %s1115_s8 = smov 8  }
 0x180   : > { %827 = dma.vmem_to_hbm [thread:$0]  (%p1543_p3), %s1419_s10, 256, %s1416_s9, %s536_s11, %s1114_s17, %s1114_s17, %s1115_s8  }
 0x181   : > { %s541_s22 = scalar_lea.sflag [#allocation12], %s1368_s21  ;;  %s1029_s29 = scalar_lea.vmem %s1426_s12, 256 }
 0x182   : > { %p1030_p7 = scmp.ne.s32.totalorder %s1426_s12, %s1029_s29  ;;  %s1116_s19 = smov [#allocation11]  }
 0x183   : > { %s1033_s27 = sshll.u32 %s1116_s19, 4  ;;  %s1034_s27 = int_to_ptr.vmem [resolvable:$false] %s1033_s27 }
 0x184   : > { %p1031_p4 = pnand %p1030_p7, %p1543_p3  ;;  %s1035_s28 = scalar_lea.vmem %s1034_s27, 512 }
 0x185   : > { %p1036_p13 = scmp.lt.s32.totalorder %s1426_s12, %s1034_s27  ;;  %p1037_p1 = scmp.lt.s32.totalorder %s1035_s28, %s1029_s29 }
 0x186   : > { %p1032_p0 = pneg %p1031_p4 }
 0x187   : > { %p1038_p5 = por %p1037_p1, %p1036_p13 }
 0x189   : > { %p1039_p9 = pnand %p1038_p5, %p1032_p0 }
 0x18b   : > { %1042 = shalt.err (!%p1039_p9)
}
 0x18c   : > { %s1043_s10 = scalar_lea.hbm %s1424_s13, 256  ;;  %s1047_s11 = scalar_lea.hbm %s1503_s7, 512 }
 0x18d   : > { %p1044_p10 = scmp.ne.s32.totalorder %s1424_s13, %s1043_s10  ;;  %p1048_p6 = scmp.lt.s32.totalorder %s1424_s13, %s1503_s7 }
 0x18e   : > { %p1049_p12 = scmp.lt.s32.totalorder %s1047_s11, %s1043_s10 }
 0x18f   : > { %p1045_p8 = pnand %p1044_p10, %p1543_p3 }
 0x190   : > { %p1050_p2 = por %p1049_p12, %p1048_p6 }
 0x191   : > { %p1046_p11 = pneg %p1045_p8 }
 0x193   : > { %p1051_p7 = pnand %p1050_p2, %p1046_p11 }
 0x195   : > { %1054 = shalt.err (!%p1051_p7)
}
 0x196   : > { %828 = dma.vmem_to_hbm [thread:$0]  (%p1543_p3), %s1426_s12, 256, %s1424_s13, %s541_s22, %s1114_s17, %s1114_s17, %s1115_s8  }
 0x197 PF: > { %s1544_s20 = sld [smem:[#allocation22_spill]]  ;;  %s585_s30 = sand.u32 1, %s1093_s24  }
 0x198   : > { %s1545_s1 = sld [smem:[#allocation19_spill]]  ;;  %s586_s26 = scalar_lea.sflag [#allocation4], %s585_s30 }
 0x19d   : > { %p1546_p4 = scmp.ne.s32.totalorder %s1544_s20, 0 }
 0x19e   : > { %p1547_p0 = scmp.ge.s32.totalorder %s1545_s1, 2 }
 0x1a0   : > { %p846_p13 = pnand %p1547_p0, %p1546_p4 }
 0x1a2   : > { %p847_p1 = pneg %p846_p13 }
 0x1a4   : > { %1084 = dma.done.wait (%p847_p1), %s586_s26, 256  }
 0x1a5   : > { %1086 = vsyncadd (%p847_p1), %s586_s26, 4294967040  ;;  %s595_s18 = scalar_lea.sflag [#allocation12], %s585_s30 }
 0x1a6   : > { %1088 = dma.done.wait (%p847_p1), %s595_s18, 256  }
 0x1a7   : > { %1090 = vsyncadd (%p847_p1), %s595_s18, 4294967040  ;;  %s1548_s27 = sld [smem:[#allocation20_spill]]  ;;  %s1551_s24 = smov %s1097_s25 }
 0x1a8   : > { %s1549_s16 = sld [smem:[#allocation18_spill]] }
 0x1a9   : > { %s1550_s26 = sld [smem:[#allocation21_spill]] }
 0x1ad   : > { %p28_p3 = scmp.ge.s32.totalorder %s1548_s27, 4  }
 0x1ae   : > { %s1552_s25 = smov %s1549_s16 }
 0x1af   :  { %30 = sbr.rel (!%p28_p3) target bundleno = 12 (0xc), region = 134 }
 0x1b4   :  { %600 = vsyncpa [#allocation3], 1 }
 0x1b5   :  { %602 = vsyncpa [#allocation3 + $0x1], 1 }
 0x1b6   :  { %603 = vsyncpa [#allocation6], 1 }
 0x1b7   :  { %605 = vsyncpa [#allocation6 + $0x1], 1 }
 0x1b8   :  { %606 = vsyncpa [#allocation9], 1 }
 0x1b9   :  { %607 = vsyncpa [#allocation4], 1 }
 0x1ba   :  { %609 = vsyncpa [#allocation4 + $0x1], 1 }
 0x1bb   :  { %610 = vsyncpa [#allocation12], 1 }
 0x1bc   :  { %612 = vsyncpa [#allocation12 + $0x1], 1 }

// kernel: tpu_custom_call.1
= control target key start
LH: loop header
LB: loop body
LE: loop exit
PB: predicated region body
PF: predicated region fallthrough
CT: control target
= control target key end

     0   :  { %s1496_s0 = inlined_call_operand.hbm [shape: f32[32,128], index: 0, kind: input, shape index: {}]   ;;  %s1497_s1 = inlined_call_operand.hbm [shape: f32[32,128], index: 1, kind: input, shape index: {}]   ;;  %s1498_s2 = inlined_call_operand.hbm [shape: f32[32,128], index: 2, kind: input, shape index: {}]   ;;  %s1499_s3 = inlined_call_operand.hbm [shape: f32[128,128], index: 3, kind: input, shape index: {}]   ;;  %s1500_s4 = inlined_call_operand.vmem [shape: f32[1,128], index: 4, kind: input, shape index: {}]   ;;  %s1501_s5 = inlined_call_operand.vmem [shape: f32[2,128], index: 5, kind: input, shape index: {}]   ;;  %s1502_s6 = inlined_call_operand.hbm [shape: f32[32,128], index: 6, kind: output, shape index: {0}]   ;;  %s1503_s7 = inlined_call_operand.hbm [shape: f32[32,128], index: 7, kind: output, shape index: {1}]  }
   0x1   :  { %1520 = sst [smem:[#allocation23_spill]] %s1497_s1 }
   0x2   :  { %13 = vsyncpa [#allocation3], 0 }
   0x3   :  { %15 = vsyncpa [#allocation3 + $0x1], 0 }
   0x4   :  { %16 = vsyncpa [#allocation6], 0 }
   0x5   :  { %18 = vsyncpa [#allocation6 + $0x1], 0 }
   0x6   :  { %19 = vsyncpa [#allocation9], 0 }
   0x7   :  { %20 = vsyncpa [#allocation4], 0 }
   0x8   :  { %22 = vsyncpa [#allocation4 + $0x1], 0 }
   0x9   :  { %23 = vsyncpa [#allocation12], 0 }
   0xa   :  { %25 = vsyncpa [#allocation12 + $0x1], 0  ;;  %s1157_s24 = smov 0   ;;  %s1159_s25 = smov 0  }
   0xb   :  { %s1161_s26 = smov 0   ;;  %s1163_s27 = smov 0  }
   0xc LB: > { %1521 = sst [smem:[#allocation18_spill]] %s1101_s26  ;;  %s1178_s28 = sadd.s32 1, %s1105_s27   ;;  %s1105_s27 = sphi %s1163_s27, %s1548_s27   ;;  %s1101_s26 = sphi %s1161_s26, %s1550_s26   ;;  %s1097_s25 = sphi %s1159_s25, %s1552_s25   ;;  %s1093_s24 = sphi %s1157_s24, %s1551_s24  }
   0xd   : > { %1522 = sst [smem:[#allocation19_spill]] %s1105_s27  ;;  %s38_s29 = sadd.s32 1, %s1101_s26 }
   0xe   : > { %1523 = sst [smem:[#allocation20_spill]] %s1178_s28  ;;  %s35_s30 = ssub.s32 %s1105_s27, %s1178_s28 }
   0xf   : > { %p1504_p0 = scmp.ne.s32.totalorder %s1101_s26, %s1097_s25  ;;  %p36_p1 = scmp.eq.s32.totalorder %s35_s30, 0 }
  0x10   : > { %p46_p2 = scmp.eq.s32.totalorder %s1105_s27, 0  ;;  %p853_p5 = scmp.lt.s32.totalorder %s1105_s27, 2 }
  0x11   : > { %s1187_s8 = scalar_select %p36_p1, %s1101_s26, %s38_s29  }
  0x12   : > { %p47_p3 = por %p46_p2, %p1504_p0  ;;  %s1509_s9 = sand.u32 1, %s1101_s26  }
  0x13   : > { %1524 = sst [smem:[#allocation21_spill]] %s1187_s8  ;;  %s1197_s10 = sshll.u32 %s1509_s9, 4 }
  0x14   : > { %s1200_s11 = sshll.u32 %s1105_s27, 8  ;;  %p1202_p6 = pnand %p853_p5, %p47_p3 }
  0x15   : > { %s282_s13 = sand.u32 1, %s1105_s27   ;;  %s1526_s1 = sld [smem:[#allocation23_spill]] }
  0x16   : > { %s286_s17 = scalar_lea.vmem [#allocation5], %s1197_s10  ;;  %s1216_s19 = scalar_lea.sflag [#allocation6], %s282_s13 }
  0x17   : > { %s293_s18 = sshll.u32 %s286_s17, 4  ;;  %p1222_p8 = pneg %p1202_p6  ;;  %s1214_s18 = int_to_ptr.vmem [resolvable:$true] %s293_s18 }
  0x1b   : > { %s1211_s16 = scalar_lea.hbm %s1526_s1, %s1200_s11  ;;  %s898_s29 = scalar_lea.hbm %s1526_s1, 512 }
  0x1c   : > { %s893_s20 = scalar_lea.hbm %s1211_s16, 256  ;;  %p899_p11 = scmp.lt.s32.totalorder %s1211_s16, %s1526_s1 }
  0x1d   : > { %p894_p7 = scmp.ne.s32.totalorder %s1211_s16, %s893_s20  ;;  %p900_p12 = scmp.lt.s32.totalorder %s898_s29, %s893_s20 }
  0x1f   : > { %p896_p9 = pnand %p1222_p8, %p894_p7  ;;  %p901_p13 = por %p900_p12, %p899_p11 }
  0x21   : > { %p897_p10 = pneg %p896_p9 }
  0x23   : > { %p902_p1 = pnand %p901_p13, %p897_p10 }
  0x25   : > { %905 = shalt.err (!%p902_p1)
}
  0x26   : > { %s906_s13 = scalar_lea.vmem %s1214_s18, 256  ;;  %s1107_s15 = smov [#allocation5]  }
  0x27   : > { %p907_p2 = scmp.ne.s32.totalorder %s1214_s18, %s906_s13  ;;  %s911_s17 = sshll.u32 %s1107_s15, 4  ;;  %s912_s17 = int_to_ptr.vmem [resolvable:$false] %s911_s17 }
  0x28   : > { %s913_s22 = scalar_lea.vmem %s912_s17, 512  ;;  %p914_p7 = scmp.lt.s32.totalorder %s1214_s18, %s912_s17 }
  0x29   : > { %p909_p3 = pnand %p907_p2, %p1222_p8  ;;  %p915_p9 = scmp.lt.s32.totalorder %s913_s22, %s906_s13 }
  0x2b   : > { %p910_p5 = pneg %p909_p3  ;;  %p916_p4 = por %p915_p9, %p914_p7 }
  0x2d   : > { %p917_p0 = pnand %p916_p4, %p910_p5 }
  0x2f   : > { %920 = shalt.err (!%p917_p0)
}
  0x30   : > { %s1505_s20 = smov 128   ;;  %s1507_s23 = smov 8  }
  0x31   : > { %841 = dma.hbm_to_vmem [thread:$0]  (!%p1202_p6), %s1211_s16, 256, %s1214_s18, %s1216_s19, %s1505_s20, %s1505_s20, %s1507_s23  }
  0x32   : > { %s1249_s29 = sadd.s32 4294967295, %s1105_s27   ;;  %s728_s30 = sadd.s32 4294967294, %s1105_s27  }
  0x33   : > { %p51_p0 = scmp.ne.s32.totalorder %s1097_s25, %s1093_s24  ;;  %p1514_p4 = scmp.eq.s32.totalorder %s1249_s29, 0 }
  0x34   : > { %p190_p10 = scmp.eq.s32.totalorder %s1249_s29, 1  ;;  %p196_p11 = scmp.eq.s32.totalorder %s728_s30, 1 }
  0x35   : > { %p1258_p12 = por %p1514_p4, %p51_p0  ;;  %p729_p13 = scmp.ge.s32.totalorder %s1105_s27, 1 }
  0x36   : > { %p1529_p1 = scmp.ne.s32.totalorder %s1101_s26, %s1097_s25  ;;  %p1270_p3 = por %p196_p11, %p51_p0 }
  0x37   : > { %s1528_s14 = scalar_select %p1258_p12, 1, 0 }
  0x38   : > { %p1266_p2 = por %p190_p10, %p1529_p1  ;;  %p229_p5 = scmp.lt.s32.totalorder %s1105_s27, 3 }
  0x39   : > { %s1531_s18 = scalar_select %p1270_p3, 1, 0 }
  0x3a   : > { %s1530_s16 = scalar_select %p1266_p2, 1, 0 }
  0x3b   : > { %1532 = sst [smem:[#allocation22_spill]] %s1531_s18  ;;  %p1275_p7 = pnand %p729_p13, %p229_p5 }
  0x3c   : > { %s1110_s15 = smov [#allocation8]   ;;  %s1287_s20 = scalar_lea.hbm %s1496_s0, %s1200_s11 }
  0x3d   : > { %s1533_s13 = scalar_select %p1275_p7, 1, 0 }
  0x3e   : > { %s241_s17 = sshll.u32 %s1110_s15, 4  ;;  %p831_p9 = pneg %p1275_p7  ;;  %s1279_s17 = int_to_ptr.vmem [resolvable:$true] %s241_s17 }
  0x3f   : > { %s265_s23 = scalar_lea.vmem [#allocation2], %s1197_s10  ;;  %s1535_s15 = sand.u32 1, %s1101_s26  }
  0x40   : > { %s272_s9 = sshll.u32 %s265_s23, 4  ;;  %p1292_p0 = pnand %p831_p9, %p1514_p4  ;;  %s1296_s9 = int_to_ptr.vmem [resolvable:$true] %s272_s9 }
  0x41   : > { %s262_s8 = scalar_lea.sflag [#allocation3], %s1535_s15  ;;  %s921_s28 = scalar_lea.hbm %s1287_s20, 256 }
  0x42   : > { %s1534_s1 = scalar_select %p1292_p0, 1, 0 }
  0x43   : > { %p922_p10 = scmp.ne.s32.totalorder %s1287_s20, %s921_s28  ;;  %s926_s27 = scalar_lea.hbm %s1496_s0, 512 }
  0x44   : > { %p927_p1 = scmp.lt.s32.totalorder %s1287_s20, %s1496_s0  ;;  %p928_p5 = scmp.lt.s32.totalorder %s926_s27, %s921_s28 }
  0x45   : > { %p924_p11 = pnand %p922_p10, %p1222_p8 }
  0x46   : > { %p929_p9 = por %p928_p5, %p927_p1 }
  0x47   : > { %p925_p13 = pneg %p924_p11 }
  0x49   : > { %p930_p4 = pnand %p929_p9, %p925_p13 }
  0x4b   : > { %933 = shalt.err (!%p930_p4)
}
  0x4c   : > { %s934_s15 = scalar_lea.vmem %s1296_s9, 256  ;;  %s1111_s26 = smov [#allocation2]  }
  0x4d   : > { %p935_p3 = scmp.ne.s32.totalorder %s1296_s9, %s934_s15  ;;  %s939_s22 = sshll.u32 %s1111_s26, 4  ;;  %s940_s22 = int_to_ptr.vmem [resolvable:$false] %s939_s22 }
  0x4e   : > { %s941_s30 = scalar_lea.vmem %s940_s22, 512  ;;  %p942_p2 = scmp.lt.s32.totalorder %s1296_s9, %s940_s22 }
  0x4f   : > { %p937_p10 = pnand %p935_p3, %p1222_p8  ;;  %p943_p12 = scmp.lt.s32.totalorder %s941_s30, %s934_s15 }
  0x51   : > { %p938_p11 = pneg %p937_p10  ;;  %p944_p7 = por %p943_p12, %p942_p2 }
  0x53   : > { %p945_p0 = pnand %p944_p7, %p938_p11 }
  0x55   : > { %948 = shalt.err (!%p945_p0)
}
  0x56   : > { %s1536_s27 = smov 8   ;;  %s1537_s28 = smov 128  }
  0x57   : > { %838 = dma.hbm_to_vmem [thread:$0]  (!%p1202_p6), %s1287_s20, 256, %s1296_s9, %s262_s8, %s1537_s28, %s1537_s28, %s1536_s27  }
  0x58   : > { %s1327_s23 = scalar_lea.hbm %s1498_s2, %s1200_s11  ;;  %p1538_p4 = scmp.ne.s32.totalorder %s1534_s1, 0 }
  0x59   : > { %s960_s15 = scalar_lea.vmem %s1279_s17, 2048  ;;  %p968_p0 = scmp.lt.s32.totalorder %s1279_s17, %s1279_s17 }
  0x5a   : > { %p951_p12 = pneg %p1538_p4  ;;  %p961_p2 = scmp.ne.s32.totalorder %s1279_s17, %s960_s15 }
  0x5b   : > { %p969_p13 = scmp.lt.s32.totalorder %s960_s15, %s960_s15 }
  0x5c   : > { %p963_p3 = pnand %p961_p2, %p951_p12 }
  0x5d   : > { %p970_p1 = por %p969_p13, %p968_p0 }
  0x5e   : > { %p964_p7 = pneg %p963_p3 }
  0x60   : > { %p971_p5 = pnand %p970_p1, %p964_p7 }
  0x62   : > { %974 = shalt.err (!%p971_p5)
}
  0x63   : > { %834 = dma.hbm_to_vmem [thread:$0]  (!%p1538_p4), %s1499_s3, 2048, %s1279_s17, [#allocation9], %s1537_s28, %s1537_s28, %s1536_s27  }
  0x64   : > { %s307_s11 = scalar_lea.vmem [#allocation7], %s1197_s10  ;;  %s975_s22 = scalar_lea.hbm %s1327_s23, 256 }
  0x65   : > { %s314_s20 = sshll.u32 %s307_s11, 4  ;;  %p976_p9 = scmp.ne.s32.totalorder %s1327_s23, %s975_s22  ;;  %s315_s20 = int_to_ptr.vmem [resolvable:$true] %s314_s20 }
  0x66   : > { %s980_s26 = scalar_lea.hbm %s1498_s2, 512  ;;  %p981_p12 = scmp.lt.s32.totalorder %s1327_s23, %s1498_s2 }
  0x67   : > { %p978_p10 = pnand %p976_p9, %p1222_p8  ;;  %p982_p2 = scmp.lt.s32.totalorder %s980_s26, %s975_s22 }
  0x69   : > { %p979_p11 = pneg %p978_p10  ;;  %p983_p3 = por %p982_p2, %p981_p12 }
  0x6b   : > { %p984_p7 = pnand %p983_p3, %p979_p11 }
  0x6d   : > { %987 = shalt.err (!%p984_p7)
}
  0x6e   : > { %s988_s10 = scalar_lea.vmem %s315_s20, 256  ;;  %s1112_s17 = smov [#allocation7]  }
  0x6f   : > { %p989_p4 = scmp.ne.s32.totalorder %s315_s20, %s988_s10  ;;  %s993_s8 = sshll.u32 %s1112_s17, 4  ;;  %s994_s8 = int_to_ptr.vmem [resolvable:$false] %s993_s8 }
  0x70   : > { %s995_s9 = scalar_lea.vmem %s994_s8, 512  ;;  %p996_p1 = scmp.lt.s32.totalorder %s315_s20, %s994_s8 }
  0x71   : > { %p991_p0 = pnand %p989_p4, %p1222_p8  ;;  %p997_p5 = scmp.lt.s32.totalorder %s995_s9, %s988_s10 }
  0x73   : > { %p992_p13 = pneg %p991_p0  ;;  %p998_p9 = por %p997_p5, %p996_p1 }
  0x75   : > { %p999_p10 = pnand %p998_p9, %p992_p13 }
  0x77   : > { %1002 = shalt.err (!%p999_p10)
}
  0x78   : > { %844 = dma.hbm_to_vmem [thread:$0]  (!%p1202_p6), %s1327_s23, 256, %s315_s20, %s1216_s19, %s1537_s28, %s1537_s28, %s1536_s27  }
  0x79   : > { %p1539_p8 = scmp.ne.s32.totalorder %s1533_s13, 0 }
  0x7a   : > { %s1368_s21 = sand.u32 (!%p1539_p8), 1, %s1097_s25   ;;  %p1540_p11 = scmp.ne.s32.totalorder (!%p1539_p8), %s1528_s14, 0 }
  0x7b   : > { %326 = sbr.rel (%p1539_p8) target bundleno = 407 (0x197), region = 44  ;;  %s1371_s11 = sshll.u32 (!%p1539_p8), %s1368_s21, 4 }
  0x7c   : > { %s329_s22 = scalar_lea.sflag (!%p1539_p8), [#allocation3], %s1368_s21  ;;  %s332_s12 = scalar_lea.vmem (!%p1539_p8), [#allocation2], %s1371_s11 }
  0x80   : > { %1072 = dma.done.wait (%p1540_p11), %s329_s22, 256  }
  0x81   : > { %1074 = vsyncadd (%p1540_p11), %s329_s22, 4294967040  ;;  %s337_s19 = sand.u32 1, %s1249_s29   ;;  %s341_s27 = scalar_lea.vmem [#allocation5], %s1371_s11 }
  0x82   : > { %s338_s13 = scalar_lea.sflag [#allocation6], %s337_s19 }
  0x83   : > { %1076 = dma.done.wait (%p1540_p11), %s338_s13, 512  }
  0x84   : > { %1078 = vsyncadd (%p1540_p11), %s338_s13, 4294966784  ;;  %s350_s28 = scalar_lea.vmem [#allocation7], %s1371_s11  ;;  %p1541_p6 = scmp.eq.s32.totalorder %s1249_s29, 0 }
  0x86   : > { %1080 = dma.done.wait (%p1541_p6), [#allocation9], 2048   ;;  %p1542_p12 = pmov %p1541_p6 }
  0x87   : > { %v422_v0 = vld [vmem:[#allocation8 + $0x78] sm:$0xff]  ;;  %v421_v1 = vld [vmem:[#allocation8 + $0x70] sm:$0xff]  ;;  %v420_v2 = vld [vmem:[#allocation8 + $0x68] sm:$0xff]  ;;  %s762_s18 = sshll.u32 %s1249_s29, 8  ;;  %s392_s15 = scalar_lea.vmem [#allocation10], %s1371_s11 }
  0x88   : > { %1082 = vsyncadd (%p1542_p12), [#allocation9], 4294965248  ;;  %782 = vmatprep.subr.mxu0 %v422_v0  ;;  %v419_v3 = vld [vmem:[#allocation8 + $0x60] sm:$0xff]  ;;  %v418_v5 = vld [vmem:[#allocation8 + $0x58] sm:$0xff]  ;;  %s554_s10 = sshll.u32 %s392_s15, 4  ;;  %s1416_s9 = scalar_lea.hbm %s1502_s6, %s762_s18  ;;  %s1419_s10 = int_to_ptr.vmem [resolvable:$true] %s554_s10 }
  0x89   : > { %783 = vmatpush3.msra.mxu0 %v422_v0  ;;  %v405_v4 = vld [vmem:[%s350_s28] sm:$0xff]  ;;  %v416_v7 = vld [vmem:[#allocation8 + $0x48] sm:$0xff]  ;;  %v414_v9 = vld [vmem:[#allocation8 + $0x38] sm:$0xff]  ;;  %s399_s22 = scalar_lea.vmem [#allocation11], %s1371_s11  ;;  %s1424_s13 = scalar_lea.hbm %s1503_s7, %s762_s18 }
  0x8a   : > { %784 = vmatprep.subr.mxu0 %v421_v1  ;;  %814 = vmatprep.mubr.f32.mxu0 %v405_v4  ;;  %v417_v6 = vld [vmem:[#allocation8 + $0x50] sm:$0xff]  ;;  %v415_v8 = vld [vmem:[#allocation8 + $0x40] sm:$0xff]  ;;  %v412_v11 = vld [vmem:[#allocation8 + $0x28] sm:$0xff]  ;;  %s536_s11 = scalar_lea.sflag [#allocation4], %s1368_s21  ;;  %p1543_p3 = scmp.ne.s32.totalorder %s1530_s16, 0 }
  0x8b   : > { %785 = vmatpush3.msra.mxu0 %v421_v1  ;;  %v413_v10 = vld [vmem:[#allocation8 + $0x30] sm:$0xff]  ;;  %v411_v12 = vld [vmem:[#allocation8 + $0x20] sm:$0xff]  ;;  %v410_v13 = vld [vmem:[#allocation8 + $0x18] sm:$0xff] }
  0x8c   : > { %786 = vmatprep.subr.mxu0 %v420_v2  ;;  %v409_v14 = vld [vmem:[#allocation8 + $0x10] sm:$0xff]  ;;  %v408_v15 = vld [vmem:[#allocation8 + $0x8] sm:$0xff]  ;;  %v407_v16 = vld [vmem:[#allocation8] sm:$0xff] }
  0x8d   : > { %787 = vmatpush3.msra.mxu0 %v420_v2  ;;  %v406_v17 = vld [vmem:[%s350_s28 + $0x8] sm:$0xff]  ;;  %v748_v18 = vld [vmem:[%s1500_s4] ss:$0 sm:$0xff]  ;;  %v750_v24 = vld [vmem:[%s1501_s5 + $0x1] ss:$0 sm:$0xff]  ;;  %s1113_s28 = smov [#allocation10]  }
  0x8e   : > { %788 = vmatprep.subr.mxu0 %v419_v3  ;;  %v508_v20 = vld [vmem:[%s332_s12 + $0x8] sm:$0xff]  ;;  %v749_v23 = vld [vmem:[%s1501_s5] ss:$0 sm:$0xff]  ;;  %s1007_s14 = sshll.u32 %s1113_s28, 4  ;;  %s1008_s14 = int_to_ptr.vmem [resolvable:$false] %s1007_s14 }
  0x8f   : > { %789 = vmatpush3.msra.mxu0 %v419_v3  ;;  %v522_v21 = vld [vmem:[%s341_s27 + $0x8] sm:$0xff]  ;;  %v507_v26 = vld [vmem:[%s332_s12] sm:$0xff]  ;;  %s570_s12 = sshll.u32 %s399_s22, 4  ;;  %s1009_s23 = scalar_lea.vmem %s1008_s14, 512  ;;  %s1426_s12 = int_to_ptr.vmem [resolvable:$true] %s570_s12 }
  0x90   : > { %790 = vmatprep.subr.mxu0 %v418_v5  ;;  %v521_v27 = vld [vmem:[%s341_s27] sm:$0xff]  ;;  %s1003_s27 = scalar_lea.vmem %s1419_s10, 256  ;;  %p1010_p0 = scmp.lt.s32.totalorder %s1419_s10, %s1008_s14 }
  0x91   : > { %791 = vmatpush3.msra.mxu0 %v418_v5  ;;  %p1004_p2 = scmp.ne.s32.totalorder %s1419_s10, %s1003_s27  ;;  %p1011_p13 = scmp.lt.s32.totalorder %s1009_s23, %s1003_s27 }
  0x92   : > { %792 = vmatprep.subr.mxu0 %v417_v6 }
  0x93   : > { %793 = vmatpush3.msra.mxu0 %v417_v6  ;;  %p1005_p7 = pnand %p1004_p2, %p1543_p3  ;;  %p1012_p1 = por %p1011_p13, %p1010_p0 }
  0x94   : > { %794 = vmatprep.subr.mxu0 %v416_v7 }
  0x95   : > { %795 = vmatpush3.msra.mxu0 %v416_v7  ;;  %p1006_p4 = pneg %p1005_p7 }
  0x96   : > { %796 = vmatprep.subr.mxu0 %v415_v8 }
  0x97   : > { %797 = vmatpush3.msra.mxu0 %v415_v8  ;;  %p1013_p5 = pnand %p1012_p1, %p1006_p4 }
  0x98   : > { %798 = vmatprep.subr.mxu0 %v414_v9 }
  0x99   : > { %799 = vmatpush3.msra.mxu0 %v414_v9 }
  0x9a   : > { %800 = vmatprep.subr.mxu0 %v413_v10 }
  0x9b   : > { %801 = vmatpush3.msra.mxu0 %v413_v10 }
  0x9c   : > { %802 = vmatprep.subr.mxu0 %v412_v11 }
  0x9d   : > { %803 = vmatpush3.msra.mxu0 %v412_v11 }
  0x9e   : > { %804 = vmatprep.subr.mxu0 %v411_v12 }
  0x9f   : > { %805 = vmatpush3.msra.mxu0 %v411_v12 }
  0xa0   : > { %806 = vmatprep.subr.mxu0 %v410_v13 }
  0xa1   : > { %807 = vmatpush3.msra.mxu0 %v410_v13 }
  0xa2   : > { %808 = vmatprep.subr.mxu0 %v409_v14 }
  0xa3   : > { %809 = vmatpush3.msra.mxu0 %v409_v14 }
  0xa4   : > { %810 = vmatprep.subr.mxu0 %v408_v15 }
  0xa5   : > { %811 = vmatpush3.msra.mxu0 %v408_v15 }
  0xa6   : > { %812 = vmatprep.subr.mxu0 %v407_v16 }
  0xa7   : > { %813 = vmatpush3.msra.mxu0 %v407_v16 }
  0xa8   : > { %815 = vmatmul.mubr.f32.vlgmr.msra.gmra.mxu0 %v406_v17 }
 0x168   : > { %v816_v19 = vpop.f32.mrf.mxu0 }
 0x169   : > { %v502_v22 = vadd.f32 %v816_v19, %v748_v18 }
 0x16a   : > { %v496_v25 = vpop.f32.mrf.mxu0 }
 0x16b   : > { %v510_v28 = vsub.f32 %v508_v20, %v502_v22  ;;  %v524_v29 = vsub.f32 %v522_v21, %v502_v22  ;;  %v497_v30 = vadd.f32 %v748_v18, %v496_v25 }
 0x16d   : > { %v516_v31 = vmul.f32 %v749_v23, %v510_v28  ;;  %v530_v32 = vmul.f32 %v750_v24, %v524_v29  ;;  %v509_v33 = vsub.f32 %v507_v26, %v497_v30  ;;  %v523_v34 = vsub.f32 %v521_v27, %v497_v30 }
 0x16f   : > { %v518_v35 = vadd.f32 %v516_v31, %v502_v22  ;;  %v532_v36 = vadd.f32 %v530_v32, %v502_v22  ;;  %v515_v37 = vmul.f32 %v749_v23, %v509_v33  ;;  %v529_v38 = vmul.f32 %v750_v24, %v523_v34 }
 0x171   : > { %520 = vst [vmem:[%s392_s15 + $0x8] sm:$0xff] %v518_v35  ;;  %534 = vst [vmem:[%s399_s22 + $0x8] sm:$0xff] %v532_v36  ;;  %v517_v39 = vadd.f32 %v515_v37, %v497_v30  ;;  %v531_v40 = vadd.f32 %v529_v38, %v497_v30 }
 0x173   : > { %519 = vst [vmem:[%s392_s15] sm:$0xff] %v517_v39  ;;  %533 = vst [vmem:[%s399_s22] sm:$0xff] %v531_v40 }
 0x174   : > { %1016 = shalt.err (!%p1013_p5)
}
 0x175   : > { %s1017_s20 = scalar_lea.hbm %s1416_s9, 256  ;;  %s1021_s26 = scalar_lea.hbm %s1502_s6, 512 }
 0x176   : > { %p1018_p9 = scmp.ne.s32.totalorder %s1416_s9, %s1017_s20  ;;  %p1022_p11 = scmp.lt.s32.totalorder %s1416_s9, %s1502_s6 }
 0x177   : > { %p1023_p6 = scmp.lt.s32.totalorder %s1021_s26, %s1017_s20 }
 0x178   : > { %p1019_p10 = pnand %p1018_p9, %p1543_p3 }
 0x179   : > { %p1024_p12 = por %p1023_p6, %p1022_p11 }
 0x17a   : > { %p1020_p8 = pneg %p1019_p10 }
 0x17c   : > { %p1025_p2 = pnand %p1024_p12, %p1020_p8 }
 0x17e   : > { %1028 = shalt.err (!%p1025_p2)
}
 0x17f   : > { %s1114_s17 = smov 128   ;;  %s1115_s8 = smov 8  }
 0x180   : > { %827 = dma.vmem_to_hbm [thread:$0]  (%p1543_p3), %s1419_s10, 256, %s1416_s9, %s536_s11, %s1114_s17, %s1114_s17, %s1115_s8  }
 0x181   : > { %s541_s22 = scalar_lea.sflag [#allocation12], %s1368_s21  ;;  %s1029_s29 = scalar_lea.vmem %s1426_s12, 256 }
 0x182   : > { %p1030_p7 = scmp.ne.s32.totalorder %s1426_s12, %s1029_s29  ;;  %s1116_s19 = smov [#allocation11]  }
 0x183   : > { %s1033_s27 = sshll.u32 %s1116_s19, 4  ;;  %s1034_s27 = int_to_ptr.vmem [resolvable:$false] %s1033_s27 }
 0x184   : > { %p1031_p4 = pnand %p1030_p7, %p1543_p3  ;;  %s1035_s28 = scalar_lea.vmem %s1034_s27, 512 }
 0x185   : > { %p1036_p13 = scmp.lt.s32.totalorder %s1426_s12, %s1034_s27  ;;  %p1037_p1 = scmp.lt.s32.totalorder %s1035_s28, %s1029_s29 }
 0x186   : > { %p1032_p0 = pneg %p1031_p4 }
 0x187   : > { %p1038_p5 = por %p1037_p1, %p1036_p13 }
 0x189   : > { %p1039_p9 = pnand %p1038_p5, %p1032_p0 }
 0x18b   : > { %1042 = shalt.err (!%p1039_p9)
}
 0x18c   : > { %s1043_s10 = scalar_lea.hbm %s1424_s13, 256  ;;  %s1047_s11 = scalar_lea.hbm %s1503_s7, 512 }
 0x18d   : > { %p1044_p10 = scmp.ne.s32.totalorder %s1424_s13, %s1043_s10  ;;  %p1048_p6 = scmp.lt.s32.totalorder %s1424_s13, %s1503_s7 }
 0x18e   : > { %p1049_p12 = scmp.lt.s32.totalorder %s1047_s11, %s1043_s10 }
 0x18f   : > { %p1045_p8 = pnand %p1044_p10, %p1543_p3 }
 0x190   : > { %p1050_p2 = por %p1049_p12, %p1048_p6 }
 0x191   : > { %p1046_p11 = pneg %p1045_p8 }
 0x193   : > { %p1051_p7 = pnand %p1050_p2, %p1046_p11 }
 0x195   : > { %1054 = shalt.err (!%p1051_p7)
}
 0x196   : > { %828 = dma.vmem_to_hbm [thread:$0]  (%p1543_p3), %s1426_s12, 256, %s1424_s13, %s541_s22, %s1114_s17, %s1114_s17, %s1115_s8  }
 0x197 PF: > { %s1544_s20 = sld [smem:[#allocation22_spill]]  ;;  %s585_s30 = sand.u32 1, %s1093_s24  }
 0x198   : > { %s1545_s1 = sld [smem:[#allocation19_spill]]  ;;  %s586_s26 = scalar_lea.sflag [#allocation4], %s585_s30 }
 0x19d   : > { %p1546_p4 = scmp.ne.s32.totalorder %s1544_s20, 0 }
 0x19e   : > { %p1547_p0 = scmp.ge.s32.totalorder %s1545_s1, 2 }
 0x1a0   : > { %p846_p13 = pnand %p1547_p0, %p1546_p4 }
 0x1a2   : > { %p847_p1 = pneg %p846_p13 }
 0x1a4   : > { %1084 = dma.done.wait (%p847_p1), %s586_s26, 256  }
 0x1a5   : > { %1086 = vsyncadd (%p847_p1), %s586_s26, 4294967040  ;;  %s595_s18 = scalar_lea.sflag [#allocation12], %s585_s30 }
 0x1a6   : > { %1088 = dma.done.wait (%p847_p1), %s595_s18, 256  }
 0x1a7   : > { %1090 = vsyncadd (%p847_p1), %s595_s18, 4294967040  ;;  %s1548_s27 = sld [smem:[#allocation20_spill]]  ;;  %s1551_s24 = smov %s1097_s25 }
 0x1a8   : > { %s1549_s16 = sld [smem:[#allocation18_spill]] }
 0x1a9   : > { %s1550_s26 = sld [smem:[#allocation21_spill]] }
 0x1ad   : > { %p28_p3 = scmp.ge.s32.totalorder %s1548_s27, 4  }
 0x1ae   : > { %s1552_s25 = smov %s1549_s16 }
 0x1af   :  { %30 = sbr.rel (!%p28_p3) target bundleno = 12 (0xc), region = 134 }
 0x1b4   :  { %600 = vsyncpa [#allocation3], 1 }
 0x1b5   :  { %602 = vsyncpa [#allocation3 + $0x1], 1 }
 0x1b6   :  { %603 = vsyncpa [#allocation6], 1 }
 0x1b7   :  { %605 = vsyncpa [#allocation6 + $0x1], 1 }
 0x1b8   :  { %606 = vsyncpa [#allocation9], 1 }
 0x1b9   :  { %607 = vsyncpa [#allocation4], 1 }
 0x1ba   :  { %609 = vsyncpa [#allocation4 + $0x1], 1 }
 0x1bb   :  { %610 = vsyncpa [#allocation12], 1 }
 0x1bc   :  { %612 = vsyncpa [#allocation12 + $0x1], 1 }

</bundles_post_ra>
